<compile_context>
chip_gen: v5e
topology: v5e:2x2
jax: 0.10.0
libtpu: 0.0.40
codegen_flags: <defaults>
</compile_context>

<pallas_src>
import jax
import jax.numpy as jnp
from jax.experimental import pallas as pl
from jax.experimental.pallas import tpu as pltpu


def _cdiv(a, b):
    return -(-a // b)


def _round_up(a, b):
    return _cdiv(a, b) * b


def _vmem_limit_bytes():
    # ~3/4 of physical VMEM (v7x: 64 MiB -> ~48 MiB; v5e/v6e: 128 MiB -> 96 MiB)
    try:
        cap = int(pltpu.get_tpu_info().vmem_capacity_bytes)
        return int(min(cap * 3 // 4, 96 * 1024 * 1024))
    except Exception:
        return 48 * 1024 * 1024


def _choose_blocks(n, c, hw, itemsize, target_bytes):
    """Pick (TN, TILE_HW, SUB).

    TILE_HW is either the full HW extent (allowed unaligned when it equals the
    array dim) or a multiple of 128 (< HW); boundary blocks of a cdiv grid are
    masked in-kernel.  TN batches samples when a full (C, HW) slab is small.
    SUB is the in-kernel lane sub-chunk (divides TILE_HW) sized so per-chunk
    f32 intermediates stay ~<=512 KiB.
    """
    bytes_per_col = c * itemsize
    budget_cols = max(128, target_bytes // bytes_per_col)
    hw128 = _round_up(hw, 128)

    if hw128 <= budget_cols:
        # Whole spatial extent fits in one block -> batch samples instead.
        tile_hw = hw
        per_sample = max(1, c * hw * itemsize)
        tn = int(min(n, max(1, target_bytes // per_sample)))
    else:
        tile_hw = (budget_cols // 128) * 128
        if tile_hw >= 512:
            tile_hw = (tile_hw // 512) * 512  # keep friendly to 512-lane chunks
        tn = 1

    # Make sure the grid has a few steps (double-buffer overlap + v7x megacore
    # split across both TensorCores) -- but never shrink blocks below ~512 KiB.
    MIN_BLOCK = 512 * 1024
    TARGET_STEPS = 4

    def steps(tn_, thw_):
        return _cdiv(n, tn_) * _cdiv(hw, thw_)

    while steps(tn, tile_hw) < TARGET_STEPS:
        blk = tn * c * tile_hw * itemsize
        if blk <= MIN_BLOCK:
            break
        if tn > 1:
            tn = (tn + 1) // 2
        elif tile_hw > 128:
            new = _round_up(max(128, tile_hw // 2), 128)
            if new >= tile_hw:
                break
            tile_hw = new
        else:
            break

    # Inner streaming sub-chunk: largest multiple of 128 dividing tile_hw with
    # per-chunk f32 footprint <= ~512 KiB; fall back to the whole (small) block.
    CHUNK_F32_BYTES = 512 * 1024
    if tile_hw % 128 == 0:
        max_sub = max(128, (CHUNK_F32_BYTES // (tn * c * 4)) // 128 * 128)
        sub = 128
        d = 128
        while d <= tile_hw:
            if tile_hw % d == 0 and d <= max_sub:
                sub = d
            d += 128
    else:
        sub = tile_hw  # unaligned full-extent block (small by construction)

    return tn, tile_hw, sub


def _make_disentangle_kernel(N, C, HW, tn, tile_hw, sub, mask_n, mask_hw):
    """One (TN, C, TILE_HW) block -> one f32 partial sum of squared diffs,
    streamed through SUB-lane chunks so intermediates stay in vregs."""
    n_sub = tile_hw // sub  # exact by construction

    def kernel(rec_ref, orig_ref, out_ref):
        n_start = pl.program_id(0) * tn
        hw_start = pl.program_id(1) * tile_hw

        def softmax_c(x):
            # softmax over the channel (sublane) axis, per (sample, spatial) column
            m = jnp.max(x, axis=1, keepdims=True)
            e = jnp.exp(x - m)
            # exact reciprocal: keeps 1e-6-level parity with the JAX reference;
            # HBM-bound kernel, the divide is not on the critical path.
            return e * pl.reciprocal(jnp.sum(e, axis=1, keepdims=True), approx=False)

        def chunk(j, acc):
            start = j * sub
            if not isinstance(start, int) and sub % 128 == 0:
                start = pl.multiple_of(start, sub)
            r = rec_ref[:, :, pl.ds(start, sub)].astype(jnp.float32)
            o = orig_ref[:, :, pl.ds(start, sub)].astype(jnp.float32)
            if mask_hw or mask_n:
                # Zero OOB rows/lanes of BOTH inputs: softmax of an all-zero
                # column is 1/C in both -> diff is exactly 0 -> no contribution.
                valid = None
                if mask_hw:
                    col = (hw_start + start
                           + jax.lax.broadcasted_iota(jnp.int32, (tn, C, sub), 2))
                    valid = col < HW
                if mask_n:
                    row = (n_start
                           + jax.lax.broadcasted_iota(jnp.int32, (tn, C, sub), 0))
                    v = row < N
                    valid = v if valid is None else jnp.logical_and(valid, v)
                zero = jnp.float32(0.0)
                r = jnp.where(valid, r, zero)
                o = jnp.where(valid, o, zero)
            d = softmax_c(r) - softmax_c(o)
            return acc + jnp.sum(d * d)

        if n_sub == 1:
            total = chunk(0, jnp.float32(0.0))
        elif n_sub <= 8:
            total = jax.lax.fori_loop(0, n_sub, chunk, jnp.float32(0.0), unroll=True)
        else:
            total = jax.lax.fori_loop(0, n_sub, chunk, jnp.float32(0.0))

        # Per-block partial sum: each grid step owns its output element, so both
        # grid axes stay parallel (no cross-step accumulation chain).
        out_ref[0, 0] = total

    return kernel


def disentangle_loss(reconstructed, original, *, target_block_bytes=4 * 1024 * 1024):
    """Single-scale loss: mean((softmax_c(rec) - softmax_c(orig))**2).

    reconstructed, original: NCHW arrays of identical shape (f32 or bf16;
    bf16 halves HBM traffic, math is always f32 inside the kernel).
    Channels (C) are kept whole per block (the softmax reduces over C).
    """
    assert reconstructed.shape == original.shape, \
        "different shape in DisentangleLoss"
    N, C, H, W = reconstructed.shape
    HW = H * W
    itemsize = jnp.dtype(reconstructed.dtype).itemsize

    # Free layout reshape (no data movement, unlike a pad): (N, C, HW)
    rec = reconstructed.reshape(N, C, HW)
    orig = original.reshape(N, C, HW)

    tn, tile_hw, sub = _choose_blocks(N, C, HW, itemsize, target_block_bytes)
    gn = _cdiv(N, tn)
    gt = _cdiv(HW, tile_hw)
    mask_n = (N % tn) != 0
    mask_hw = (HW % tile_hw) != 0

    kernel = _make_disentangle_kernel(N, C, HW, tn, tile_hw, sub, mask_n, mask_hw)

    partials = pl.pallas_call(
        kernel,
        out_shape=jax.ShapeDtypeStruct((gn, gt), jnp.float32),
        grid_spec=pltpu.PrefetchScalarGridSpec(
            num_scalar_prefetch=0,
            grid=(gn, gt),
            in_specs=[
                pl.BlockSpec((tn, C, tile_hw), lambda n, t: (n, 0, t)),
                pl.BlockSpec((tn, C, tile_hw), lambda n, t: (n, 0, t)),
            ],
            out_specs=pl.BlockSpec(
                (1, 1), lambda n, t: (n, t),
                memory_space=pltpu.MemorySpace.SMEM),
        ),
        compiler_params=pltpu.CompilerParams(
            # Both axes independent; on v7x the megacore split uses these.
            dimension_semantics=("parallel", "parallel"),
            vmem_limit_bytes=_vmem_limit_bytes()),
    )(rec, orig)

    total_elems = N * C * H * W  # true (unmasked) element count
    return jnp.sum(partials) / jnp.float32(total_elems)


def ms_disentangle_loss(reconstructed_list, original_list):
    """Multi-scale loss: sum of per-scale losses (MSDisentangleLoss.forward)."""
    assert len(reconstructed_list) == len(original_list), \
        "please make sure multi-scale output"
    total = jnp.float32(0.0)
    for r, o in zip(reconstructed_list, original_list):
        total = total + disentangle_loss(r, o)
    return total


def _reference_loss(reconstructed, original):
    sr = jax.nn.softmax(reconstructed.astype(jnp.float32), axis=1)
    so = jax.nn.softmax(original.astype(jnp.float32), axis=1)
    return jnp.mean((sr - so) ** 2)


# TODO(synk): the remaining RebuttalResNet forward (HRNet-style RGB2DepthNet /
# Backbone encoders, SynchronizedBatchNorm2d, conv decoders, bilinear
# interpolation, ComplementaryGatedFusion) is a full multi-stage network, not
# a single kernel; only the disentangle-loss reduction is implemented here.

if __name__ == "__main__":
    key = jax.random.PRNGKey(0)
    ks = jax.random.split(key, 10)

    # Multi-scale demo (matches MSDisentangleLoss over two scales).
    # scale 0: HW = 256 (exercises TN sample batching)
    # scale 1: HW = 64  (full-extent unaligned lane block, no pad, no mask)
    r0 = jax.random.normal(ks[0], (2, 4, 16, 16), dtype=jnp.float32)
    o0 = jax.random.normal(ks[1], (2, 4, 16, 16), dtype=jnp.float32)
    r1 = jax.random.normal(ks[2], (2, 8, 8, 8), dtype=jnp.float32)
    o1 = jax.random.normal(ks[3], (2, 8, 8, 8), dtype=jnp.float32)
    out = jax.block_until_ready(ms_disentangle_loss([r0, r1], [o0, o1]))
    ref = _reference_loss(r0, o0) + _reference_loss(r1, o1)
    assert jnp.allclose(out, ref, rtol=1e-5, atol=1e-6), (out, ref)

    # Unaligned HW (= 400) with a multi-step grid -> masked boundary lane block.
    r2 = jax.random.normal(ks[4], (2, 8, 20, 20), dtype=jnp.float32)
    o2 = jax.random.normal(ks[5], (2, 8, 20, 20), dtype=jnp.float32)
    out2 = jax.block_until_ready(disentangle_loss(r2, o2, target_block_bytes=4096))
    ref2 = _reference_loss(r2, o2)
    assert jnp.allclose(out2, ref2, rtol=1e-5, atol=1e-6), (out2, ref2)

    # Sample batching with N not divisible by TN -> masked boundary row block.
    r3 = jax.random.normal(ks[6], (3, 4, 16, 16), dtype=jnp.float32)
    o3 = jax.random.normal(ks[7], (3, 4, 16, 16), dtype=jnp.float32)
    out3 = jax.block_until_ready(disentangle_loss(r3, o3, target_block_bytes=8192))
    ref3 = _reference_loss(r3, o3)
    assert jnp.allclose(out3, ref3, rtol=1e-5, atol=1e-6), (out3, ref3)

    # Larger blocks -> in-kernel sub-chunk streaming (fori_loop path).
    r4 = jax.random.normal(ks[8], (4, 16, 128, 128), dtype=jnp.float32)
    o4 = jax.random.normal(ks[9], (4, 16, 128, 128), dtype=jnp.float32)
    out4 = jax.block_until_ready(disentangle_loss(r4, o4))
    ref4 = _reference_loss(r4, o4)
    assert jnp.allclose(out4, ref4, rtol=1e-4, atol=1e-6), (out4, ref4)

    # bf16 transport path (halves HBM bytes; math still f32 in-kernel).
    r5 = r0.astype(jnp.bfloat16)
    o5 = o0.astype(jnp.bfloat16)
    out5 = jax.block_until_ready(disentangle_loss(r5, o5))
    ref5 = _reference_loss(r5, o5)
    assert jnp.allclose(out5, ref5, rtol=1e-4, atol=1e-6), (out5, ref5)

    print("KERNEL_OK")
</pallas_src>

<mosaic_0001>
module attributes {stable_mosaic.version = 11 : i64} {
  func.func @kernel(%arg0: i32, %arg1: i32, %arg2: memref<2x4x256xf32, #tpu.memory_space<vmem>>, %arg3: memref<2x4x256xf32, #tpu.memory_space<vmem>>, %arg4: memref<1x1xf32, #tpu.memory_space<smem>>) attributes {dimension_semantics = [#tpu.dimension_semantics<parallel>, #tpu.dimension_semantics<parallel>], iteration_bounds = array<i64: 1, 1>, scalar_prefetch = 0 : i64, scratch_operands = 0 : i64, tpu.core_type = #tpu.core_type<tc>, window_params = [{transform_indices = @transform_0, window_bounds = array<i64: 2, 4, 256>}, {transform_indices = @transform_1, window_bounds = array<i64: 2, 4, 256>}, {transform_indices = @transform_2, window_bounds = array<i64: 1, 1>}]} {
    %c0 = arith.constant 0 : index
    %c0_0 = arith.constant 0 : index
    %c0_1 = arith.constant 0 : index
    %0 = vector.load %arg2[%c0, %c0_0, %c0_1] : memref<2x4x256xf32, #tpu.memory_space<vmem>>, vector<2x4x256xf32>
    %c0_2 = arith.constant 0 : index
    %c0_3 = arith.constant 0 : index
    %c0_4 = arith.constant 0 : index
    %1 = vector.load %arg3[%c0_2, %c0_3, %c0_4] : memref<2x4x256xf32, #tpu.memory_space<vmem>>, vector<2x4x256xf32>
    %cst = arith.constant dense<0xFF800000> : vector<2x256xf32>
    %2 = vector.multi_reduction <maximumf>, %0, %cst [1] : vector<2x4x256xf32> to vector<2x256xf32>
    %3 = vector.shape_cast %2 : vector<2x256xf32> to vector<2x1x256xf32>
    %4 = vector.broadcast %3 : vector<2x1x256xf32> to vector<2x4x256xf32>
    %5 = arith.subf %0, %4 : vector<2x4x256xf32>
    %6 = math.exp %5 : vector<2x4x256xf32>
    %cst_5 = arith.constant dense<0.000000e+00> : vector<2x256xf32>
    %7 = vector.multi_reduction <add>, %6, %cst_5 [1] : vector<2x4x256xf32> to vector<2x256xf32>
    %8 = vector.shape_cast %7 : vector<2x256xf32> to vector<2x1x256xf32>
    %9 = tpu.reciprocal %8 : vector<2x1x256xf32> -> vector<2x1x256xf32>
    %10 = vector.broadcast %9 : vector<2x1x256xf32> to vector<2x4x256xf32>
    %11 = arith.mulf %6, %10 : vector<2x4x256xf32>
    %cst_6 = arith.constant dense<0xFF800000> : vector<2x256xf32>
    %12 = vector.multi_reduction <maximumf>, %1, %cst_6 [1] : vector<2x4x256xf32> to vector<2x256xf32>
    %13 = vector.shape_cast %12 : vector<2x256xf32> to vector<2x1x256xf32>
    %14 = vector.broadcast %13 : vector<2x1x256xf32> to vector<2x4x256xf32>
    %15 = arith.subf %1, %14 : vector<2x4x256xf32>
    %16 = math.exp %15 : vector<2x4x256xf32>
    %cst_7 = arith.constant dense<0.000000e+00> : vector<2x256xf32>
    %17 = vector.multi_reduction <add>, %16, %cst_7 [1] : vector<2x4x256xf32> to vector<2x256xf32>
    %18 = vector.shape_cast %17 : vector<2x256xf32> to vector<2x1x256xf32>
    %19 = tpu.reciprocal %18 : vector<2x1x256xf32> -> vector<2x1x256xf32>
    %20 = vector.broadcast %19 : vector<2x1x256xf32> to vector<2x4x256xf32>
    %21 = arith.mulf %16, %20 : vector<2x4x256xf32>
    %22 = arith.subf %11, %21 : vector<2x4x256xf32>
    %23 = arith.mulf %22, %22 : vector<2x4x256xf32>
    %24 = vector.shape_cast %23 : vector<2x4x256xf32> to vector<1x2x4x256xf32>
    %cst_8 = arith.constant dense<0.000000e+00> : vector<1xf32>
    %25 = vector.multi_reduction <add>, %24, %cst_8 [1, 2, 3] : vector<1x2x4x256xf32> to vector<1xf32>
    %26 = vector.shape_cast %25 : vector<1xf32> to vector<1x1x1x1xf32>
    %27 = vector.extract %26[0, 0, 0, 0] : f32 from vector<1x1x1x1xf32>
    %cst_9 = arith.constant 0.000000e+00 : f32
    %28 = arith.addf %cst_9, %27 : f32
    %c0_10 = arith.constant 0 : index
    %c0_11 = arith.constant 0 : index
    %29 = memref.load %arg4[%c0_10, %c0_11] : memref<1x1xf32, #tpu.memory_space<smem>>
    memref.store %28, %arg4[%c0_10, %c0_11] : memref<1x1xf32, #tpu.memory_space<smem>>
    return
  }
  func.func @transform_0(%arg0: i32, %arg1: i32) -> (i32, i32, i32) {
    %c0_i32 = arith.constant 0 : i32
    %c0_i32_0 = arith.constant 0 : i32
    return %arg0, %c0_i32, %arg1 : i32, i32, i32
  }
  func.func @transform_1(%arg0: i32, %arg1: i32) -> (i32, i32, i32) {
    %c0_i32 = arith.constant 0 : i32
    %c0_i32_0 = arith.constant 0 : i32
    return %arg0, %c0_i32, %arg1 : i32, i32, i32
  }
  func.func @transform_2(%arg0: i32, %arg1: i32) -> (i32, i32) {
    %c0_i32 = arith.constant 0 : i32
    return %arg0, %arg1 : i32, i32
  }
}

</mosaic_0001>

<bundles_post_ra>
// kernel: tpu_custom_call.1
= control target key start
LH: loop header
LB: loop body
LE: loop exit
PB: predicated region body
PF: predicated region fallthrough
CT: control target
= control target key end

     0   :  { %7 = vsyncpa [#allocation3], 0  ;;  %s765_s0 = inlined_call_operand.hbm [shape: f32[2,4,256], index: 0, kind: input, shape index: {}]   ;;  %s766_s1 = inlined_call_operand.hbm [shape: f32[2,4,256], index: 1, kind: input, shape index: {}]   ;;  %s767_s2 = inlined_call_operand.hbm [shape: f32[1,1], index: 2, kind: output, shape index: {}]  }
   0x1   :  { %8 = vsyncpa [#allocation6], 0 }
   0x2   :  { %9 = vsyncpa [#allocation4], 0  ;;  %s14_s11 = sshll.u32 %s765_s0, 4  ;;  %s531_s12 = smov [#allocation2]   ;;  %s15_s11 = int_to_ptr.hbm [resolvable:$true] %s14_s11 }
   0x3   :  { %s16_s13 = sshll.u32 %s531_s12, 4  ;;  %s27_s16 = sshll.u32 %s766_s1, 4  ;;  %s17_s13 = int_to_ptr.vmem [resolvable:$true] %s16_s13  ;;  %s28_s16 = int_to_ptr.hbm [resolvable:$true] %s27_s16 }
   0x4   :  { %s532_s17 = smov 128   ;;  %s533_s18 = smov 8  }
   0x5   :  { %22 = dma.hbm_to_vmem [thread:$0]  %s15_s11, 256, %s17_s13, [#allocation3], %s532_s17, %s532_s17, %s533_s18  }
   0x6   :  { %s534_s19 = smov [#allocation5]  }
   0x7   :  { %s29_s20 = sshll.u32 %s534_s19, 4  ;;  %s30_s20 = int_to_ptr.vmem [resolvable:$true] %s29_s20 }
   0x8   :  { %35 = dma.hbm_to_vmem [thread:$0]  %s28_s16, 256, %s30_s20, [#allocation6], %s532_s17, %s532_s17, %s533_s18  }
   0x9   :  { %525 = dma.done.wait [#allocation3], 256  }
   0xa   :  { %526 = vsyncadd [#allocation3], 4294967040 }
   0xb   :  { %527 = dma.done.wait [#allocation6], 256  }
   0xc   :  { %528 = vsyncadd [#allocation6], 4294967040  ;;  %v44_v0 = vld [vmem:[#allocation2] sm:$0xff]  ;;  %v45_v1 = vld [vmem:[#allocation2 + $0x8] sm:$0xff]  ;;  %vm61_vm0 = vcmask 1043456   ;;  %s422_s21 = sshll.u32 %s767_s2, 4  ;;  %s423_s21 = int_to_ptr.hbm [resolvable:$true] %s422_s21 }
   0xd   :  { %50 = vst [vmem:[#allocation1] ss:$2 sm:$0xff] %v44_v0  ;;  %v569_v44 = vld [vmem:[#allocation5] sm:$0xff]  ;;  %v571_v45 = vld [vmem:[#allocation5 + $0x8] sm:$0xff]  ;;  %s535_s23 = smov [#allocation7]  }
   0xe   :  { %54 = vst [vmem:[#allocation1 + $0x10] ss:$2 sm:$0xff] %v45_v1 }
  0x14   :  { %v51_v2 = vld.sshfl [vmem:[#allocation1] sm:$0xff pattern:$0x75316420]  ;;  %v52_v3 = vld.sshfl [vmem:[#allocation1 + $0x8] sm:$0xff pattern:$0x75316420] }
  0x15   :  { %v55_v4 = vld.sshfl [vmem:[#allocation1 + $0x10] sm:$0xff pattern:$0x75316420]  ;;  %v56_v5 = vld.sshfl [vmem:[#allocation1 + $0x18] sm:$0xff pattern:$0x75316420] }
  0x16   :  { %v62_v6 = vsel %vm61_vm0, %v51_v2, -inf  ;;  %v69_v7 = vsel %vm61_vm0, %v52_v3, -inf  ;;  %v76_v8 = vsel %vm61_vm0, %v55_v4, -inf  ;;  %v83_v9 = vsel %vm61_vm0, %v56_v5, -inf }
  0x17   :  { %v63_v10 = vrot.slane %v62_v6, 4  ;;  %v70_v11 = vrot.slane %v69_v7, 4  ;;  %v77_v12 = vrot.slane %v76_v8, 4  ;;  %v84_v13 = vrot.slane %v83_v9, 4 }
  0x19   :  { %v64_v14 = vmax.f32 %v62_v6, %v63_v10  ;;  %v71_v15 = vmax.f32 %v69_v7, %v70_v11  ;;  %v78_v16 = vmax.f32 %v76_v8, %v77_v12  ;;  %v85_v17 = vmax.f32 %v83_v9, %v84_v13 }
  0x1b   :  { %v65_v18 = vrot.slane %v64_v14, 2  ;;  %v72_v19 = vrot.slane %v71_v15, 2  ;;  %v79_v20 = vrot.slane %v78_v16, 2  ;;  %v86_v21 = vrot.slane %v85_v17, 2 }
  0x1d   :  { %v66_v22 = vmax.f32 %v64_v14, %v65_v18  ;;  %v73_v23 = vmax.f32 %v71_v15, %v72_v19  ;;  %v80_v24 = vmax.f32 %v78_v16, %v79_v20  ;;  %v87_v25 = vmax.f32 %v85_v17, %v86_v21 }
  0x1f   :  { %v67_v26 = vrot.slane %v66_v22, 1  ;;  %v74_v27 = vrot.slane %v73_v23, 1  ;;  %v81_v28 = vrot.slane %v80_v24, 1  ;;  %v88_v29 = vrot.slane %v87_v25, 1 }
  0x21   :  { %v68_v30 = vmax.f32 %v66_v22, %v67_v26  ;;  %v75_v31 = vmax.f32 %v73_v23, %v74_v27  ;;  %v82_v32 = vmax.f32 %v80_v24, %v81_v28  ;;  %v89_v33 = vmax.f32 %v87_v25, %v88_v29 }
  0x23   :  { %v94_v34 = vrot.slane %v75_v31, 4  ;;  %v95_v35 = vrot.slane %v89_v33, 4 }
  0x25   :  { %v96_v36 = vsel %vm61_vm0, %v68_v30, %v94_v34  ;;  %v97_v37 = vsel %vm61_vm0, %v82_v32, %v95_v35 }
  0x26   :  { %v100_v38 = vsub.f32 %v44_v0, %v96_v36  ;;  %v101_v39 = vsub.f32 %v45_v1, %v97_v37 }
  0x28   :  { %v102_v40 = vmul.f32 1.442695, %v100_v38  ;;  %v104_v41 = vmul.f32 1.442695, %v101_v39 }
  0x2a   :  { %441 = vpow2.f32 %v102_v40 }
  0x2b   :  { %443 = vpow2.f32 %v104_v41 }
  0x30   :  { %v563_v42 = vpop.eup %441 }
  0x31   :  { %v565_v43 = vpop.eup %443  ;;  %108 = vst [vmem:[#allocation1] ss:$2 sm:$0xff] %v563_v42 }
  0x32   :  { %112 = vst [vmem:[#allocation1 + $0x10] ss:$2 sm:$0xff] %v565_v43 }
  0x38   :  { %v109_v46 = vld.sshfl [vmem:[#allocation1] sm:$0xff pattern:$0x75316420]  ;;  %v110_v47 = vld.sshfl [vmem:[#allocation1 + $0x8] sm:$0xff pattern:$0x75316420] }
  0x39   :  { %v113_v48 = vld.sshfl [vmem:[#allocation1 + $0x10] sm:$0xff pattern:$0x75316420]  ;;  %v114_v49 = vld.sshfl [vmem:[#allocation1 + $0x18] sm:$0xff pattern:$0x75316420] }
  0x3a   :  { %217 = vst [vmem:[#allocation1] ss:$2 sm:$0xff] %v569_v44  ;;  %v119_v50 = vsel %vm61_vm0, %v109_v46, 0.0  ;;  %v126_v51 = vsel %vm61_vm0, %v110_v47, 0.0  ;;  %v133_v63 = vsel %vm61_vm0, %v113_v48, 0.0  ;;  %v140_v3 = vsel %vm61_vm0, %v114_v49, 0.0 }
  0x3b   :  { %221 = vst [vmem:[#allocation1 + $0x10] ss:$2 sm:$0xff] %v571_v45  ;;  %v127_v56 = vrot.slane %v126_v51, 4  ;;  %v120_v57 = vrot.slane %v119_v50, 4  ;;  %v134_v6 = vrot.slane %v133_v63, 4  ;;  %v141_v8 = vrot.slane %v140_v3, 4 }
  0x3d   :  { %v128_v62 = vadd.f32 %v127_v56, %v126_v51  ;;  %v121_v2 = vadd.f32 %v120_v57, %v119_v50  ;;  %v135_v16 = vadd.f32 %v134_v6, %v133_v63  ;;  %v142_v20 = vadd.f32 %v141_v8, %v140_v3 }
  0x3f   :  { %v129_v7 = vrot.slane %v128_v62, 2  ;;  %v122_v11 = vrot.slane %v121_v2, 2  ;;  %v136_v26 = vrot.slane %v135_v16, 2  ;;  %v143_v31 = vrot.slane %v142_v20, 2 }
  0x41   :  { %v218_v52 = vld.sshfl [vmem:[#allocation1] sm:$0xff pattern:$0x75316420]  ;;  %v219_v53 = vld.sshfl [vmem:[#allocation1 + $0x8] sm:$0xff pattern:$0x75316420]  ;;  %v130_v19 = vadd.f32 %v129_v7, %v128_v62  ;;  %v123_v22 = vadd.f32 %v122_v11, %v121_v2  ;;  %v137_v38 = vadd.f32 %v136_v26, %v135_v16  ;;  %v144_v41 = vadd.f32 %v143_v31, %v142_v20 }
  0x42   :  { %v222_v54 = vld.sshfl [vmem:[#allocation1 + $0x10] sm:$0xff pattern:$0x75316420]  ;;  %v223_v55 = vld.sshfl [vmem:[#allocation1 + $0x18] sm:$0xff pattern:$0x75316420] }
  0x43   :  { %v228_v58 = vsel %vm61_vm0, %v218_v52, -inf  ;;  %v235_v59 = vsel %vm61_vm0, %v219_v53, -inf  ;;  %v242_v60 = vsel %vm61_vm0, %v222_v54, -inf  ;;  %v249_v61 = vsel %vm61_vm0, %v223_v55, -inf }
  0x44   :  { %v229_v0 = vrot.slane %v228_v58, 4  ;;  %v236_v1 = vrot.slane %v235_v59, 4  ;;  %v243_v4 = vrot.slane %v242_v60, 4  ;;  %v250_v5 = vrot.slane %v249_v61, 4 }
  0x45   :  { %v131_v30 = vrot.slane %v130_v19, 1  ;;  %v124_v33 = vrot.slane %v123_v22, 1  ;;  %v138_v51 = vrot.slane %v137_v38, 1  ;;  %v145_v53 = vrot.slane %v144_v41, 1 }
  0x46   :  { %v230_v9 = vmax.f32 %v228_v58, %v229_v0  ;;  %v237_v10 = vmax.f32 %v235_v59, %v236_v1  ;;  %v244_v12 = vmax.f32 %v242_v60, %v243_v4  ;;  %v251_v13 = vmax.f32 %v249_v61, %v250_v5 }
  0x47   :  { %v583_v40 = vadd.f32 %v131_v30, %v130_v19  ;;  %v585_v47 = vadd.f32 %v124_v33, %v123_v22  ;;  %v593_v56 = vadd.f32 %v138_v51, %v137_v38  ;;  %v595_v57 = vadd.f32 %v145_v53, %v144_v41 }
  0x48   :  { %v231_v14 = vrot.slane %v230_v9, 2  ;;  %v238_v15 = vrot.slane %v237_v10, 2  ;;  %v245_v17 = vrot.slane %v244_v12, 2  ;;  %v252_v18 = vrot.slane %v251_v13, 2 }
  0x49   :  { %445 = vrcp.f32 %v583_v40  ;;  %v156_v2 = vand.u32 2147483647, %v585_v47  ;;  %v158_v3 = vand.u32 2147483648, %v585_v47  ;;  %v170_v4 = vand.u32 2147483647, %v583_v40 }
  0x4a   :  { %v232_v21 = vmax.f32 %v230_v9, %v231_v14  ;;  %v239_v23 = vmax.f32 %v237_v10, %v238_v15  ;;  %v246_v24 = vmax.f32 %v244_v12, %v245_v17  ;;  %v253_v25 = vmax.f32 %v251_v13, %v252_v18 }
  0x4b   :  { %447 = vrcp.f32 %v585_v47  ;;  %vm152_vm1 = vweird.f32 %v585_v47  ;;  %vm166_vm2 = vweird.f32 %v583_v40  ;;  %v159_v20 = vor.u32 1.1754944e-38, %v158_v3 }
  0x4c   :  { %v233_v27 = vrot.slane %v232_v21, 1  ;;  %v240_v28 = vrot.slane %v239_v23, 1  ;;  %v247_v29 = vrot.slane %v246_v24, 1  ;;  %v254_v32 = vrot.slane %v253_v25, 1 }
  0x4d   :  { %vm180_vm4 = vweird.f32 %v593_v56  ;;  %vm643_vm7 = vcmp.eq.f32.partialorder %v170_v4, 8.507059e+37  ;;  %vm194_vm10 = vweird.f32 %v595_v57  ;;  %vm157_vm13 = vcmp.eq.f32.partialorder %v156_v2, 8.507059e+37 }
  0x4e   :  { %v234_v34 = vmax.f32 %v232_v21, %v233_v27  ;;  %v241_v35 = vmax.f32 %v239_v23, %v240_v28  ;;  %v248_v36 = vmax.f32 %v246_v24, %v247_v29  ;;  %v255_v37 = vmax.f32 %v253_v25, %v254_v32 }
  0x4f   :  { %v597_v58 = vpop.eup %445  ;;  %v172_v21 = vand.u32 2147483648, %v583_v40 }
  0x50   :  { %v260_v39 = vrot.slane %v241_v35, 4  ;;  %v261_v46 = vrot.slane %v255_v37, 4  ;;  %v162_v60 = vmul.f32 %v597_v58, %v583_v40  ;;  %vm167_vm3 = vweird.f32 %v597_v58 }
  0x51   :  { %v599_v59 = vpop.eup %447  ;;  %vm638_vm5 = vmor %vm166_vm2, %vm167_vm3 }
  0x52   :  { %v262_v48 = vsel %vm61_vm0, %v234_v34, %v260_v39  ;;  %v263_v49 = vsel %vm61_vm0, %v248_v36, %v261_v46  ;;  %v148_v61 = vmul.f32 %v599_v59, %v585_v47  ;;  %v163_v63 = vsub.f32 1.0, %v162_v60 }
  0x53   :  { %v266_v50 = vsub.f32 %v569_v44, %v262_v48  ;;  %v267_v52 = vsub.f32 %v571_v45, %v263_v49  ;;  %vm153_vm6 = vweird.f32 %v599_v59  ;;  %v173_v36 = vor.u32 1.1754944e-38, %v172_v21 }
  0x54   :  { %v149_v1 = vsub.f32 1.0, %v148_v61  ;;  %v164_v7 = vmul.f32 %v597_v58, %v163_v63  ;;  %vm658_vm9 = vmor %vm152_vm1, %vm153_vm6  ;;  %v200_v60 = vand.u32 2147483648, %v595_v57 }
  0x55   :  { %v268_v54 = vmul.f32 1.442695, %v266_v50  ;;  %v270_v55 = vmul.f32 1.442695, %v267_v52 }
  0x56   :  { %v150_v26 = vmul.f32 %v599_v59, %v149_v1  ;;  %v165_v27 = vadd.f32 %v597_v58, %v164_v7  ;;  %v198_v7 = vand.u32 2147483647, %v595_v57 }
  0x57   :  { %449 = vpow2.f32 %v268_v54 }
  0x58   :  { %451 = vpow2.f32 %v270_v55  ;;  %v151_v41 = vadd.f32 %v599_v59, %v150_v26  ;;  %v169_v46 = vsel %vm638_vm5, %v597_v58, %v165_v27  ;;  %v184_v55 = vand.u32 2147483647, %v593_v56 }
  0x59   :  { %453 = vrcp.f32 %v593_v56  ;;  %v186_v58 = vand.u32 2147483648, %v593_v56  ;;  %v174_v3 = vsel %vm643_vm7, %v173_v36, %v169_v46  ;;  %vm199_vm1 = vcmp.eq.f32.partialorder %v198_v7, 8.507059e+37 }
  0x5a   :  { %455 = vrcp.f32 %v595_v57  ;;  %vm185_vm15 = vcmp.eq.f32.partialorder %v184_v55, 8.507059e+37 }
  0x5d   :  { %v602_v44 = vpop.eup %449 }
  0x5e   :  { %v605_v45 = vpop.eup %451  ;;  %274 = vst [vmem:[#allocation1] ss:$2 sm:$0xff] %v602_v44 }
  0x5f   :  { %278 = vst [vmem:[#allocation1 + $0x10] ss:$2 sm:$0xff] %v605_v45  ;;  %v613_v62 = vpop.eup %453 }
  0x60   :  { %v615_v0 = vpop.eup %455  ;;  %v176_v8 = vmul.f32 %v613_v62, %v593_v56  ;;  %vm181_vm8 = vweird.f32 %v613_v62 }
  0x61   :  { %v190_v9 = vmul.f32 %v615_v0, %v595_v57  ;;  %vm195_vm11 = vweird.f32 %v615_v0  ;;  %vm680_vm12 = vmor %vm180_vm4, %vm181_vm8  ;;  %v201_v57 = vor.u32 1.1754944e-38, %v200_v60 }
  0x62   :  { %v177_v28 = vsub.f32 1.0, %v176_v8  ;;  %v155_v8 = vsel %vm658_vm9, %v599_v59, %v151_v41  ;;  %vm691_vm14 = vmor %vm194_vm10, %vm195_vm11 }
  0x63   :  { %v191_v29 = vsub.f32 1.0, %v190_v9  ;;  %v160_v59 = vsel %vm157_vm13, %v159_v20, %v155_v8 }
  0x64   :  { %v178_v48 = vmul.f32 %v613_v62, %v177_v28 }
  0x65   :  { %v275_v5 = vld.sshfl [vmem:[#allocation1] sm:$0xff pattern:$0x75316420]  ;;  %v276_v6 = vld.sshfl [vmem:[#allocation1 + $0x8] sm:$0xff pattern:$0x75316420]  ;;  %v192_v49 = vmul.f32 %v615_v0, %v191_v29 }
  0x66   :  { %v279_v10 = vld.sshfl [vmem:[#allocation1 + $0x10] sm:$0xff pattern:$0x75316420]  ;;  %v280_v11 = vld.sshfl [vmem:[#allocation1 + $0x18] sm:$0xff pattern:$0x75316420]  ;;  %v179_v4 = vadd.f32 %v613_v62, %v178_v48 }
  0x67   :  { %v285_v12 = vsel %vm61_vm0, %v275_v5, 0.0  ;;  %v292_v13 = vsel %vm61_vm0, %v276_v6, 0.0  ;;  %v299_v14 = vsel %vm61_vm0, %v279_v10, 0.0  ;;  %v306_v15 = vsel %vm61_vm0, %v280_v11, 0.0 }
  0x68   :  { %v286_v16 = vrot.slane %v285_v12, 4  ;;  %v293_v17 = vrot.slane %v292_v13, 4  ;;  %v300_v18 = vrot.slane %v299_v14, 4  ;;  %v307_v19 = vrot.slane %v306_v15, 4 }
  0x69   :  { %v193_v6 = vadd.f32 %v615_v0, %v192_v49  ;;  %v187_v10 = vor.u32 1.1754944e-38, %v186_v58  ;;  %v207_v11 = vrot.slane %v174_v3, 4  ;;  %v183_v47 = vsel %vm680_vm12, %v613_v62, %v179_v4 }
  0x6a   :  { %v287_v22 = vadd.f32 %v286_v16, %v285_v12  ;;  %v294_v23 = vadd.f32 %v293_v17, %v292_v13  ;;  %v301_v24 = vadd.f32 %v300_v18, %v299_v14  ;;  %v308_v25 = vadd.f32 %v307_v19, %v306_v15 }
  0x6b   :  { %v197_v2 = vsel %vm691_vm14, %v615_v0, %v193_v6  ;;  %v188_v15 = vsel %vm185_vm15, %v187_v10, %v183_v47  ;;  %v209_v17 = vsel %vm61_vm0, %v160_v59, %v207_v11 }
  0x6c   :  { %v288_v31 = vrot.slane %v287_v22, 2  ;;  %v295_v32 = vrot.slane %v294_v23, 2  ;;  %v302_v33 = vrot.slane %v301_v24, 2  ;;  %v309_v34 = vrot.slane %v308_v25, 2 }
  0x6d   :  { %v202_v16 = vsel %vm199_vm1, %v201_v57, %v197_v2  ;;  %v213_v3 = vmul.f32 %v563_v42, %v209_v17 }
  0x6e   :  { %v289_v37 = vadd.f32 %v288_v31, %v287_v22  ;;  %v296_v38 = vadd.f32 %v295_v32, %v294_v23  ;;  %v303_v39 = vadd.f32 %v302_v33, %v301_v24  ;;  %v310_v40 = vadd.f32 %v309_v34, %v308_v25 }
  0x6f   :  { %v208_v41 = vrot.slane %v202_v16, 4 }
  0x70   :  { %v290_v50 = vrot.slane %v289_v37, 1  ;;  %v297_v51 = vrot.slane %v296_v38, 1  ;;  %v304_v52 = vrot.slane %v303_v39, 1  ;;  %v311_v53 = vrot.slane %v310_v40, 1 }
  0x72   :  { %v667_v61 = vadd.f32 %v290_v50, %v289_v37  ;;  %v669_v63 = vadd.f32 %v297_v51, %v296_v38  ;;  %v671_v1 = vadd.f32 %v304_v52, %v303_v39  ;;  %v695_v56 = vadd.f32 %v311_v53, %v310_v40 }
  0x74   :  { %457 = vrcp.f32 %v667_v61  ;;  %v324_v12 = vand.u32 2147483648, %v667_v61  ;;  %v338_v13 = vand.u32 2147483648, %v669_v63  ;;  %vm318_vm2 = vweird.f32 %v667_v61 }
  0x75   :  { %459 = vrcp.f32 %v669_v63  ;;  %v322_v62 = vand.u32 2147483647, %v667_v61  ;;  %vm332_vm3 = vweird.f32 %v669_v63  ;;  %v336_v22 = vand.u32 2147483647, %v669_v63 }
  0x76   :  { %461 = vrcp.f32 %v671_v1  ;;  %v325_v20 = vor.u32 1.1754944e-38, %v324_v12  ;;  %vm346_vm4 = vweird.f32 %v671_v1  ;;  %v339_v24 = vor.u32 1.1754944e-38, %v338_v13 }
  0x77   :  { %463 = vrcp.f32 %v695_v56  ;;  %v350_v28 = vand.u32 2147483647, %v671_v1  ;;  %v352_v29 = vand.u32 2147483648, %v671_v1  ;;  %vm360_vm9 = vweird.f32 %v695_v56 }
  0x78   :  { %v364_v35 = vand.u32 2147483647, %v695_v56  ;;  %v366_v36 = vand.u32 2147483648, %v695_v56  ;;  %vm323_vm12 = vcmp.eq.f32.partialorder %v322_v62, 8.507059e+37  ;;  %vm337_vm13 = vcmp.eq.f32.partialorder %v336_v22, 8.507059e+37 }
  0x79   :  { %vm351_vm15 = vcmp.eq.f32.partialorder %v350_v28, 8.507059e+37  ;;  %v353_v53 = vor.u32 1.1754944e-38, %v352_v29 }
  0x7a   :  { %v458_v14 = vpop.eup %457  ;;  %v367_v54 = vor.u32 1.1754944e-38, %v366_v36 }
  0x7b   :  { %v460_v18 = vpop.eup %459  ;;  %v314_v19 = vmul.f32 %v458_v14, %v667_v61  ;;  %vm319_vm5 = vweird.f32 %v458_v14 }
  0x7c   :  { %v462_v0 = vpop.eup %461  ;;  %v328_v21 = vmul.f32 %v460_v18, %v669_v63  ;;  %vm333_vm6 = vweird.f32 %v460_v18  ;;  %vm723_vm8 = vmor %vm318_vm2, %vm319_vm5  ;;  %vm365_vm2 = vcmp.eq.f32.partialorder %v364_v35, 8.507059e+37 }
  0x7d   :  { %v315_v23 = vsub.f32 1.0, %v314_v19  ;;  %v342_v25 = vmul.f32 %v462_v0, %v671_v1  ;;  %v464_v26 = vpop.eup %463  ;;  %vm347_vm7 = vweird.f32 %v462_v0  ;;  %vm732_vm10 = vmor %vm332_vm3, %vm333_vm6  ;;  %v210_v1 = vsel %vm61_vm0, %v188_v15, %v208_v41 }
  0x7e   :  { %v329_v27 = vsub.f32 1.0, %v328_v21  ;;  %v356_v32 = vmul.f32 %v464_v26, %v695_v56  ;;  %vm361_vm11 = vweird.f32 %v464_v26  ;;  %vm739_vm14 = vmor %vm346_vm4, %vm347_vm7  ;;  %v214_v56 = vmul.f32 %v565_v43, %v210_v1 }
  0x7f   :  { %v316_v30 = vmul.f32 %v458_v14, %v315_v23  ;;  %v343_v31 = vsub.f32 1.0, %v342_v25  ;;  %vm362_vm1 = vmor %vm360_vm9, %vm361_vm11 }
  0x80   :  { %v330_v34 = vmul.f32 %v460_v18, %v329_v27  ;;  %v357_v40 = vsub.f32 1.0, %v356_v32 }
  0x81   :  { %v317_v37 = vadd.f32 %v458_v14, %v316_v30  ;;  %v344_v39 = vmul.f32 %v462_v0, %v343_v31 }
  0x82   :  { %v331_v46 = vadd.f32 %v460_v18, %v330_v34  ;;  %v358_v51 = vmul.f32 %v464_v26, %v357_v40 }
  0x83   :  { %v321_v49 = vsel %vm723_vm8, %v458_v14, %v317_v37  ;;  %v345_v50 = vadd.f32 %v462_v0, %v344_v39 }
  0x84   :  { %v335_v52 = vsel %vm732_vm10, %v460_v18, %v331_v46  ;;  %v326_v55 = vsel %vm323_vm12, %v325_v20, %v321_v49  ;;  %v359_v61 = vadd.f32 %v464_v26, %v358_v51 }
  0x85   :  { %v340_v58 = vsel %vm337_vm13, %v339_v24, %v335_v52  ;;  %v349_v60 = vsel %vm739_vm14, %v462_v0, %v345_v50 }
  0x86   :  { %v373_v63 = vrot.slane %v340_v58, 4  ;;  %v363_v4 = vsel %vm362_vm1, %v464_v26, %v359_v61  ;;  %v354_v5 = vsel %vm351_vm15, %v353_v53, %v349_v60 }
  0x87   :  { %v368_v6 = vsel %vm365_vm2, %v367_v54, %v363_v4 }
  0x88   :  { %v375_v7 = vsel %vm61_vm0, %v326_v55, %v373_v63  ;;  %v374_v8 = vrot.slane %v368_v6, 4 }
  0x89   :  { %v379_v9 = vmul.f32 %v602_v44, %v375_v7 }
  0x8a   :  { %v376_v10 = vsel %vm61_vm0, %v354_v5, %v374_v8 }
  0x8b   :  { %v381_v57 = vsub.f32 %v213_v3, %v379_v9  ;;  %v380_v11 = vmul.f32 %v605_v45, %v376_v10 }
  0x8d   :  { %v383_v59 = vmul.f32 %v381_v57, %v381_v57  ;;  %v382_v47 = vsub.f32 %v214_v56, %v380_v11 }
  0x8f   :  { %387 = vst [vmem:[#allocation1] ss:$2 sm:$0xff] %v383_v59  ;;  %v384_v2 = vmul.f32 %v382_v47, %v382_v47 }
  0x91   :  { %391 = vst [vmem:[#allocation1 + $0x10] ss:$2 sm:$0xff] %v384_v2 }
  0x96   :  { %v388_v42 = vld.sshfl [vmem:[#allocation1] sm:$0xff pattern:$0x75316420]  ;;  %v389_v12 = vld.sshfl [vmem:[#allocation1 + $0x8] sm:$0xff pattern:$0x75316420] }
  0x97   :  { %v398_v13 = vsel %vm61_vm0, %v388_v42, 0.0  ;;  %v399_v14 = vsel %vm61_vm0, %v389_v12, 0.0 }
  0x98   :  { %v400_v15 = vadd.f32 %v399_v14, %v398_v13  ;;  %v392_v44 = vld.sshfl [vmem:[#allocation1 + $0x10] sm:$0xff pattern:$0x75316420]  ;;  %v393_v16 = vld.sshfl [vmem:[#allocation1 + $0x18] sm:$0xff pattern:$0x75316420] }
  0x99   :  { %v401_v43 = vsel %vm61_vm0, %v392_v44, 0.0  ;;  %v403_v17 = vsel %vm61_vm0, %v393_v16, 0.0 }
  0x9a   :  { %v402_v18 = vadd.f32 %v401_v43, %v400_v15 }
  0x9c   :  { %v404_v45 = vadd.f32 %v403_v17, %v402_v18 }
  0x9e   :  { %405 = vadd.xlane.f32.xlu0 %v404_v45 }
 0x111   :  { %v406_v19 = vpop.xlane.xlu0 %405 }
 0x112   :  { %v407_v62 = vrot.slane %v406_v19, 4 }
 0x114   :  { %v408_v0 = vadd.f32 %v407_v62, %v406_v19 }
 0x116   :  { %v409_v20 = vrot.slane %v408_v0, 2 }
 0x118   :  { %v410_v21 = vadd.f32 %v409_v20, %v408_v0 }
 0x11a   :  { %v411_v22 = vrot.slane %v410_v21, 1 }
 0x11c   :  { %v412_v23 = vadd.f32 %v411_v22, %v410_v21 }
 0x11e   :  { %434 = vpush %v412_v23 }
 0x14f   :  { %s435_s22 = spop %434 }
 0x150   :  { %416 = sst [smem:[#allocation7]] %s435_s22 }
 0x151   :  { %425 = dma.smem_to_hbm %s535_s23, 16, %s423_s21, [#allocation4]  }
 0x152   :  { %529 = dma.done.wait [#allocation4], 16  }
 0x153   :  { %530 = vsyncadd [#allocation4], 4294967280 }
 0x154   :  { %430 = sfence }
 0x155   :  { %431 = vsyncpa [#allocation3], 1 }
 0x156   :  { %432 = vsyncpa [#allocation6], 1 }
 0x157   :  { %433 = vsyncpa [#allocation4], 1 }

</bundles_post_ra>
